<compile_context>
chip_gen: v5e
topology: v5e:2x2
jax: 0.10.0
libtpu: 0.0.40
codegen_flags: <defaults>
</compile_context>

<pallas_src>
import math

import jax
import jax.numpy as jnp
from jax.experimental import pallas as pl
from jax.experimental.pallas import tpu as pltpu


def _rup(a, m):
    return ((a + m - 1) // m) * m


def _make_kernel(TG, R, C, L, inv_cm1):
    # bf16 expansion matmul is exact while target lanes are < 256.
    use_bf16 = (R > 1) and (L <= 256)

    def kernel(x_ref, t_ref, o_ref):
        x = x_ref[...].astype(jnp.float32)                     # (TG, L)
        t = t_ref[...]                                          # (TG, R) int32
        lane = jax.lax.broadcasted_iota(jnp.int32, (TG, L), 1)  # lane index

        if R == 1:
            # Unpacked path (C is already lane-friendly): broadcast compare.
            pos = lane == t                                     # (TG,L) vs (TG,1)
        else:
            # Expand the per-row target lane across its C lanes with a tiny
            # matmul against E[r, l] = 1{ l in [r*C, r*C + C) } (idle MXU).
            r_io = jax.lax.broadcasted_iota(jnp.int32, (R, L), 0)
            l_io = jax.lax.broadcasted_iota(jnp.int32, (R, L), 1)
            e_mask = (l_io >= r_io * C) & (l_io < r_io * C + C)
            if use_bf16:
                t_exp = jnp.dot(t.astype(jnp.bfloat16),
                                e_mask.astype(jnp.bfloat16),
                                preferred_element_type=jnp.float32)
            else:
                t_exp = jnp.dot(t.astype(jnp.float32),
                                e_mask.astype(jnp.float32),
                                precision=jax.lax.Precision.HIGHEST,
                                preferred_element_type=jnp.float32)
            pos = lane == t_exp.astype(jnp.int32)

        # Single transcendental per element:
        #   positive class: 1.0     * log(x)
        #   negative class: 1/(C-1) * log(1 - x)
        z = jnp.where(pos, x, 1.0 - x)
        w = jnp.where(pos, jnp.float32(1.0), jnp.float32(inv_cm1))
        # Sublane-only reduction -> dense (1, L) lane-vector partial.
        o_ref[...] = jnp.sum(w * jnp.log(z), axis=0, keepdims=True)

    return kernel


def negtive_log(x, y, *, block_rows=None):
    """x: (B, C) floats in (0, 1); y: (B,) int class indices. Returns (1,) float32."""
    B, C = x.shape
    if C < 2:
        raise ValueError("negtive_log requires C >= 2 (1/(C-1) term).")
    itemsize = jnp.dtype(x.dtype).itemsize
    inv_cm1 = 1.0 / float(C - 1)

    # Lane-dense packing factor: fold R rows into one packed row of width L = R*C.
    if 2 <= C <= 64:
        R = 128 // math.gcd(C, 128)
    else:
        R = 1                       # C already wide (or a multiple of 128)
    L = R * C
    lane_w = _rup(L, 128)           # lane-padded width (for VMEM budgeting)
    G = pl.cdiv(B, R)               # packed rows needed to cover B

    # Tile sizing: ~2 MiB of (lane-padded) x per block, multiple of 8 sublanes.
    if block_rows is not None:
        tg = _rup(max(1, int(block_rows)), 8)
    else:
        tg = max(8, ((2 << 20) // (lane_w * itemsize)) // 8 * 8)
    tg = min(tg, _rup(G, 8))
    # v7x megacore: prefer >= 2 parallel tiles when there is enough work.
    if block_rows is None and tg >= G and G >= 16:
        tg = _rup(pl.cdiv(G, 2), 8)
    n = pl.cdiv(G, tg)
    Gp = n * tg
    Bp = Gp * R

    # Per-row target lane inside its packed row; padded rows get x = 0 and
    # target = -1 so they contribute exactly 0 to the sum.
    t = (jnp.arange(B, dtype=jnp.int32) % R) * C + y.astype(jnp.int32)
    if Bp != B:
        x = jnp.pad(x, ((0, Bp - B), (0, 0)))
        t = jnp.pad(t, (0, Bp - B), constant_values=-1)
    xp = jnp.reshape(x, (Gp, L))    # metadata-only when no padding was needed
    tp = jnp.reshape(t, (Gp, R))

    # Explicit VMEM budget: double-buffered x/t blocks + out block (+ headroom).
    sub = 8 if itemsize >= 4 else (16 if itemsize == 2 else 32)
    x_blk = _rup(tg, sub) * lane_w * itemsize
    t_blk = _rup(tg, 8) * 128 * 4
    o_blk = 8 * lane_w * 4
    vlim = int(min(48 << 20, max(32 << 20, 2 * (x_blk + t_blk) + 2 * o_blk + (8 << 20))))

    kernel = _make_kernel(tg, R, C, L, inv_cm1)

    partials = pl.pallas_call(
        kernel,
        out_shape=jax.ShapeDtypeStruct((n, L), jnp.float32),
        grid=(n,),
        in_specs=[
            pl.BlockSpec((tg, L), lambda i: (i, 0)),   # packed x tile (native dtype)
            pl.BlockSpec((tg, R), lambda i: (i, 0)),   # packed target-lane tile
        ],
        out_specs=pl.BlockSpec((1, L), lambda i: (i, 0)),
        compiler_params=pltpu.CompilerParams(
            dimension_semantics=("parallel",),
            vmem_limit_bytes=vlim,
        ),
        cost_estimate=pl.CostEstimate(
            flops=8 * Gp * L + 2 * Gp * R * L,
            transcendentals=Gp * L,
            bytes_accessed=Gp * L * itemsize + Gp * R * 4 + n * L * 4,
        ),
    )(xp, tp)

    # Tiny XLA epilogue: -mean over the true batch size.
    loss = -(jnp.sum(partials, dtype=jnp.float32) / jnp.float32(B))
    return loss.reshape(1)


def _reference(x, y):
    B, C = x.shape
    xf = x.astype(jnp.float32)
    oh = jax.nn.one_hot(y, C, dtype=jnp.float32)
    label_t = jnp.sum(xf * oh, axis=-1, keepdims=True)
    avg_neg = jnp.sum(jnp.log(1.0 - xf) * (1.0 - oh), axis=-1, keepdims=True) / (C - 1)
    return -jnp.mean(jnp.log(label_t) + avg_neg, axis=0)


if __name__ == "__main__":
    key = jax.random.PRNGKey(0)
    k1, k2, k3, k4, k5, k6 = jax.random.split(key, 6)

    # Test 1: tiny shape (B < packing factor -> exercises the zero-contribution pad path).
    B, C = 8, 4
    x = jax.nn.softmax(jax.random.normal(k1, (B, C), dtype=jnp.float32), axis=-1)
    y = jax.random.randint(k2, (B,), 0, C, dtype=jnp.int32)
    out = negtive_log(x, y)
    jax.block_until_ready(out)
    ref = _reference(x, y)
    assert out.shape == (1,)
    assert jnp.allclose(out, ref, rtol=1e-5, atol=1e-5), (out, ref)

    # Test 2: aligned packed path, 2 parallel tiles (megacore split), no padding.
    B2, C2 = 512, 4
    x2 = jax.nn.softmax(jax.random.normal(k3, (B2, C2), dtype=jnp.float32), axis=-1)
    y2 = jax.random.randint(k4, (B2,), 0, C2, dtype=jnp.int32)
    out2 = negtive_log(x2, y2)
    jax.block_until_ready(out2)
    ref2 = _reference(x2, y2)
    assert jnp.allclose(out2, ref2, rtol=1e-5, atol=1e-5), (out2, ref2)

    # Test 3: C multiple of 128 -> unpacked (R == 1) branch, forced multi-tile.
    B3, C3 = 64, 128
    x3 = jax.nn.softmax(jax.random.normal(k5, (B3, C3), dtype=jnp.float32), axis=-1)
    y3 = jax.random.randint(k6, (B3,), 0, C3, dtype=jnp.int32)
    out3 = negtive_log(x3, y3, block_rows=16)
    jax.block_until_ready(out3)
    ref3 = _reference(x3, y3)
    assert jnp.allclose(out3, ref3, rtol=1e-5, atol=1e-5), (out3, ref3)

    print("KERNEL_OK")
</pallas_src>

<mosaic_0001>
module attributes {stable_mosaic.version = 11 : i64} {
  func.func @kernel(%arg0: i32, %arg1: memref<8x128xf32, #tpu.memory_space<vmem>>, %arg2: memref<8x32xi32, #tpu.memory_space<vmem>>, %arg3: memref<1x128xf32, #tpu.memory_space<vmem>>) attributes {dimension_semantics = [#tpu.dimension_semantics<parallel>], iteration_bounds = array<i64: 1>, scalar_prefetch = 0 : i64, scratch_operands = 0 : i64, tpu.core_type = #tpu.core_type<tc>, window_params = [{transform_indices = @transform_0, window_bounds = array<i64: 8, 128>}, {transform_indices = @transform_1, window_bounds = array<i64: 8, 32>}, {transform_indices = @transform_2, window_bounds = array<i64: 1, 128>}]} {
    %c0 = arith.constant 0 : index
    %c0_0 = arith.constant 0 : index
    %0 = vector.load %arg1[%c0, %c0_0] : memref<8x128xf32, #tpu.memory_space<vmem>>, vector<8x128xf32>
    %c0_1 = arith.constant 0 : index
    %c0_2 = arith.constant 0 : index
    %1 = vector.load %arg2[%c0_1, %c0_2] : memref<8x32xi32, #tpu.memory_space<vmem>>, vector<8x32xi32>
    %2 = tpu.iota {dimensions = array<i32: 1>} : vector<8x128xi32>
    %3 = tpu.iota {dimensions = array<i32: 0>} : vector<32x128xi32>
    %4 = tpu.iota {dimensions = array<i32: 1>} : vector<32x128xi32>
    %c4_i32 = arith.constant 4 : i32
    %5 = vector.broadcast %c4_i32 : i32 to vector<32x128xi32>
    %6 = arith.muli %3, %5 : vector<32x128xi32>
    %7 = arith.cmpi sge, %4, %6 : vector<32x128xi32>
    %c4_i32_3 = arith.constant 4 : i32
    %8 = vector.broadcast %c4_i32_3 : i32 to vector<32x128xi32>
    %9 = arith.muli %3, %8 : vector<32x128xi32>
    %c4_i32_4 = arith.constant 4 : i32
    %10 = vector.broadcast %c4_i32_4 : i32 to vector<32x128xi32>
    %11 = arith.addi %9, %10 : vector<32x128xi32>
    %12 = arith.cmpi slt, %4, %11 : vector<32x128xi32>
    %13 = arith.andi %7, %12 : vector<32x128xi1>
    %14 = arith.sitofp %1 : vector<8x32xi32> to vector<8x32xbf16>
    %15 = arith.extui %13 : vector<32x128xi1> to vector<32x128xi32>
    %16 = arith.sitofp %15 : vector<32x128xi32> to vector<32x128xf32>
    %17 = arith.truncf %16 : vector<32x128xf32> to vector<32x128xbf16>
    %cst = arith.constant dense<0.000000e+00> : vector<8x128xf32>
    %18 = tpu.matmul %14, %17, %cst {dimension_numbers = #tpu.dot_dimension_numbers<[1], [0], [0], [1], [0, 0, 1, 1], [], []>} : vector<8x32xbf16>, vector<32x128xbf16>, vector<8x128xf32> -> vector<8x128xf32>
    %19 = arith.fptosi %18 : vector<8x128xf32> to vector<8x128xi32>
    %20 = arith.cmpi eq, %2, %19 : vector<8x128xi32>
    %cst_5 = arith.constant 1.000000e+00 : f32
    %21 = vector.broadcast %cst_5 : f32 to vector<8x128xf32>
    %22 = arith.subf %21, %0 : vector<8x128xf32>
    %23 = arith.select %20, %0, %22 : vector<8x128xi1>, vector<8x128xf32>
    %cst_6 = arith.constant 1.000000e+00 : f32
    %cst_7 = arith.constant 0.333333343 : f32
    %24 = vector.broadcast %cst_6 : f32 to vector<8x128xf32>
    %25 = vector.broadcast %cst_7 : f32 to vector<8x128xf32>
    %26 = arith.select %20, %24, %25 : vector<8x128xi1>, vector<8x128xf32>
    %27 = math.log %23 : vector<8x128xf32>
    %28 = arith.mulf %26, %27 : vector<8x128xf32>
    %cst_8 = arith.constant dense<0.000000e+00> : vector<128xf32>
    %29 = vector.multi_reduction <add>, %28, %cst_8 [0] : vector<8x128xf32> to vector<128xf32>
    %30 = vector.shape_cast %29 : vector<128xf32> to vector<1x128xf32>
    %c0_9 = arith.constant 0 : index
    %c0_10 = arith.constant 0 : index
    %31 = vector.load %arg3[%c0_9, %c0_10] : memref<1x128xf32, #tpu.memory_space<vmem>>, vector<1x128xf32>
    tpu.vector_store %arg3[%c0_9, %c0_10], %30 {strides = array<i32>} : memref<1x128xf32, #tpu.memory_space<vmem>>, vector<1x128xf32>,
    return
  }
  func.func @transform_0(%arg0: i32) -> (i32, i32) {
    %c0_i32 = arith.constant 0 : i32
    %c0_i32_0 = arith.constant 0 : i32
    return %arg0, %c0_i32 : i32, i32
  }
  func.func @transform_1(%arg0: i32) -> (i32, i32) {
    %c0_i32 = arith.constant 0 : i32
    %c0_i32_0 = arith.constant 0 : i32
    return %arg0, %c0_i32 : i32, i32
  }
  func.func @transform_2(%arg0: i32) -> (i32, i32) {
    %c0_i32 = arith.constant 0 : i32
    %c0_i32_0 = arith.constant 0 : i32
    return %arg0, %c0_i32 : i32, i32
  }
}

</mosaic_0001>

<bundles_post_ra>
// kernel: tpu_custom_call.1
= control target key start
LH: loop header
LB: loop body
LE: loop exit
PB: predicated region body
PF: predicated region fallthrough
CT: control target
= control target key end

     0   :  { %7 = vsyncpa [#allocation3], 0  ;;  %s260_s0 = inlined_call_operand.hbm [shape: f32[8,128], index: 0, kind: input, shape index: {}]   ;;  %s261_s1 = inlined_call_operand.hbm [shape: s32[8,32], index: 1, kind: input, shape index: {}]   ;;  %s262_s2 = inlined_call_operand.hbm [shape: f32[1,128], index: 2, kind: output, shape index: {}]  }
   0x1   :  { %8 = vsyncpa [#allocation6], 0 }
   0x2   :  { %9 = vsyncpa [#allocation4], 0  ;;  %s15_s11 = sshll.u32 %s260_s0, 4  ;;  %s231_s12 = smov [#allocation2]   ;;  %s16_s11 = int_to_ptr.hbm [resolvable:$true] %s15_s11 }
   0x3   :  { %s17_s13 = sshll.u32 %s231_s12, 4  ;;  %s26_s16 = sshll.u32 %s261_s1, 4  ;;  %s18_s13 = int_to_ptr.vmem [resolvable:$true] %s17_s13  ;;  %s27_s16 = int_to_ptr.hbm [resolvable:$true] %s26_s16 }
   0x4   :  { %20 = dma.hbm_to_vmem [thread:$0]  %s16_s11, 128, %s18_s13, [#allocation3]  }
   0x5   :  { %s232_s17 = smov [#allocation5]  }
   0x6   :  { %s28_s18 = sshll.u32 %s232_s17, 4  ;;  %s29_s18 = int_to_ptr.vmem [resolvable:$true] %s28_s18 }
   0x7   :  { %31 = dma.hbm_to_vmem [thread:$0]  %s27_s16, 128, %s29_s18, [#allocation6]  }
   0x8   :  { %225 = dma.done.wait [#allocation3], 128  }
   0x9   :  { %226 = vsyncadd [#allocation3], 4294967168 }
   0xa   :  { %227 = dma.done.wait [#allocation6], 128  }
   0xb   :  { %228 = vsyncadd [#allocation6], 4294967168  ;;  %v43_v0 = vlaneseq  ;;  %v42_v14 = vld [vmem:[#allocation5] sm:$0xff]  ;;  %v233_v16 = vmov 1.0|1.0   ;;  %vm82_vm14 = vcmask 261120  }
   0xc   :  { %v70_v15 = vcvt.s32.f32 %v42_v14  ;;  %v41_v18 = vld [vmem:[#allocation2] sm:$0xff]  ;;  %v234_v29 = vmov 0.33333334   ;;  %s235_s0 = smov [#allocation7]   ;;  %s121_s21 = sshll.u32 %s262_s2, 4  ;;  %s122_s21 = int_to_ptr.hbm [resolvable:$true] %s121_s21 }
   0xd   :  { %v46_v1 = vshrl.u32 %v43_v0, 7  ;;  %v44_v2 = vand.u32 127, %v43_v0  ;;  %v101_v23 = vsub.f32 1.0, %v41_v18  ;;  %s119_s1 = sshll.u32 %s235_s0, 4  ;;  %s120_s1 = int_to_ptr.vmem [resolvable:$true] %s119_s1 }
   0xe   :  { %v71_v17 = vpack.c.bf16 %v70_v15, %v70_v15 }
   0xf   :  { %v48_v3 = vadd.s32 16, %v46_v1  ;;  %v49_v4 = vadd.s32 24, %v46_v1  ;;  %v47_v5 = vadd.s32 8, %v46_v1  ;;  %v50_v6 = vmul.u32 4, %v46_v1 }
  0x11   :  { %v52_v7 = vmul.u32 4, %v48_v3  ;;  %v53_v8 = vmul.u32 4, %v49_v4  ;;  %v51_v9 = vmul.u32 4, %v47_v5  ;;  %vm54_vm0 = vcmp.ge.s32.totalorder %v44_v2, %v50_v6 }
  0x12   :  { %v58_v10 = vadd.s32 4, %v50_v6 }
  0x13   :  { %vm56_vm1 = vcmp.ge.s32.totalorder %v44_v2, %v52_v7  ;;  %v60_v11 = vadd.s32 4, %v52_v7  ;;  %v61_v12 = vadd.s32 4, %v53_v8  ;;  %vm57_vm2 = vcmp.ge.s32.totalorder %v44_v2, %v53_v8 }
  0x14   :  { %v59_v13 = vadd.s32 4, %v51_v9  ;;  %vm62_vm3 = vcmp.lt.s32.totalorder %v44_v2, %v58_v10  ;;  %vm55_vm8 = vcmp.ge.s32.totalorder %v44_v2, %v51_v9 }
  0x15   :  { %vm64_vm4 = vcmp.lt.s32.totalorder %v44_v2, %v60_v11  ;;  %vm65_vm5 = vcmp.lt.s32.totalorder %v44_v2, %v61_v12  ;;  %vm66_vm6 = vmand %vm54_vm0, %vm62_vm3 }
  0x16   :  { %vm68_vm7 = vmand %vm56_vm1, %vm64_vm4  ;;  %vm63_vm9 = vcmp.lt.s32.totalorder %v44_v2, %v59_v13 }
  0x17   :  { %vm69_vm10 = vmand %vm57_vm2, %vm65_vm5 }
  0x18   :  { %vm136_vm11 = vmpackc.low %vm69_vm10, %vm68_vm7 }
  0x19   :  { %137 = vmatpush.bf16.msk.msra.mxu0 %vm136_vm11, %v233_v16  ;;  %vm67_vm12 = vmand %vm55_vm8, %vm63_vm9 }
  0x1a   :  { %vm138_vm13 = vmpackc.low %vm67_vm12, %vm66_vm6 }
  0x1d   :  { %139 = vmatpush.bf16.msk.msra.mxu0 %vm138_vm13, %v233_v16 }
  0x20   :  { %140 = vmatmul.msk.bf16.vlgmr.msra.gmra.mxu0 %vm82_vm14, %v71_v17 }
  0x9d   :  { %v95_v19 = vpop.f32.mrf.mxu0 }
  0x9e   :  { %vm141_vm15 = vcmp.lt.s32.totalorder %v95_v19, 0  ;;  %v142_v20 = vceil.f32 %v95_v19  ;;  %v143_v21 = vfloor.f32 %v95_v19 }
  0xa0   :  { %v144_v22 = vsel %vm141_vm15, %v142_v20, %v143_v21 }
  0xa1   :  { %v145_v24 = vcvt.f32.s32 %v144_v22 }
  0xa3   :  { %vm100_vm0 = vcmp.eq.s32.totalorder %v44_v2, %v145_v24 }
  0xa4   :  { %v102_v25 = vsel %vm100_vm0, %v41_v18, %v101_v23  ;;  %v103_v30 = vsel %vm100_vm0, 1.0, %v234_v29 }
  0xa5   :  { %151 = vlog2.f32 %v102_v25  ;;  %v97_v26 = vpop.f32.mrf.mxu0 }
  0xab   :  { %v152_v27 = vpop.eup %151 }
  0xac   :  { %v105_v28 = vmul.f32 0.6931472, %v152_v27 }
  0xae   :  { %v106_v31 = vmul.f32 %v105_v28, %v103_v30 }
  0xb0   :  { %v107_v32 = vrot.slane %v106_v31, 4 }
  0xb2   :  { %v108_v33 = vadd.f32 %v107_v32, %v106_v31 }
  0xb4   :  { %v109_v34 = vrot.slane %v108_v33, 2 }
  0xb6   :  { %v110_v35 = vadd.f32 %v109_v34, %v108_v33 }
  0xb8   :  { %v111_v36 = vrot.slane %v110_v35, 1 }
  0xba   :  { %v112_v37 = vadd.f32 %v111_v36, %v110_v35 }
  0xbc   :  { %113 = vst [vmem:[#allocation7] sm:$0x1] %v112_v37 }
  0xbd   :  { %124 = dma.vmem_to_hbm [thread:$0]  %s120_s1, 16, %s122_s21, [#allocation4]  }
  0xbe   :  { %229 = dma.done.wait [#allocation4], 16  }
  0xbf   :  { %230 = vsyncadd [#allocation4], 4294967280 }
  0xc0   :  { %129 = vsyncpa [#allocation3], 1 }
  0xc1   :  { %130 = vsyncpa [#allocation6], 1 }
  0xc2   :  { %131 = vsyncpa [#allocation4], 1 }

</bundles_post_ra>
